<compile_context>
chip_gen: v6e
topology: v6e:2x2x1
jax: 0.10.0
libtpu: 0.0.40
codegen_flags: <defaults>
</compile_context>

<pallas_src>
import math
from functools import partial

import jax
import jax.numpy as jnp
from jax import lax
from jax.experimental import pallas as pl
from jax.experimental.pallas import tpu as pltpu

GN_EPS = 1e-5  # nn.GroupNorm default eps


# ---------------- fused Pallas kernel ----------------------------------------

def _fused_kernel(p_ref, w1_ref, g_ref, beta_ref, w2_ref, b2_ref, o_ref):
    # p_ref   : (TB, N2, KP)  one row per final (stage-2) patch; the row holds
    #                         the kk=k2*k2 stage-1 sub-patches back to back,
    #                         each ordered (c_in, a, b).
    # w1_ref  : (KP, CE)      block-diagonal conv1 weight (kk copies of W1).
    # g_ref   : (1, 1, CE)    GroupNorm(1, C1) gamma, tiled kk times.
    # beta_ref: (1, 1, CE)    GroupNorm(1, C1) beta, tiled kk times.
    # w2_ref  : (CE, C2)      conv2 weight, rows ordered (dh, dw, c1).
    # b2_ref  : (1, C2)       conv2 bias.
    # o_ref   : (TB, N2, C2)
    TB, N2, KP = p_ref.shape
    CE = w1_ref.shape[1]
    C2 = w2_ref.shape[1]

    # --- conv1: single MXU matmul, f32 accumulation regardless of input dtype
    p = p_ref[...].reshape(TB * N2, KP)
    y = jnp.dot(p, w1_ref[...], preferred_element_type=jnp.float32)
    y = y.reshape(TB, N2, CE)

    # --- GroupNorm(num_groups=1): per-sample stats over all (N2, CE) values
    #     (same element set as the reference's (C1, H1, W1)).  f32 math.
    inv_n = 1.0 / float(N2 * CE)
    mean = jnp.sum(jnp.sum(y, axis=2, keepdims=True), axis=1, keepdims=True) * inv_n
    yc = y - mean
    var = jnp.sum(jnp.sum(yc * yc, axis=2, keepdims=True), axis=1, keepdims=True) * inv_n
    scale = g_ref[...] * lax.rsqrt(var + GN_EPS)       # gamma folded into rsqrt
    yn = yc * scale + beta_ref[...]

    # --- exact erf GELU (nn.GELU default; kept for bit-parity with the module)
    act = 0.5 * yn * (1.0 + lax.erf(yn * (1.0 / math.sqrt(2.0))))

    # --- conv2: single (TB*N2, CE) x (CE, C2) MXU matmul; activation columns
    #     are already in w2's (dh, dw, c1) row order, so no regroup is needed.
    act = act.reshape(TB * N2, CE).astype(w2_ref.dtype)
    out = jnp.dot(act, w2_ref[...], preferred_element_type=jnp.float32) + b2_ref[...]
    o_ref[...] = out.reshape(TB, N2, C2).astype(o_ref.dtype)


# ---------------- parameter preparation (done once) --------------------------

def prepare_params(params, mxu_dtype=jnp.float32):
    """One-time parameter reshapes, hoisted out of the forward path.

    Returns (arrays, (k1, k2)) where
      arrays = (w1blk, gamma_tiled, beta_tiled, w2r, b2r).
    Use mxu_dtype=jnp.bfloat16 at production sizes (GN/GELU stay f32).
    """
    (w1, g1, beta1), (w2, b2) = params
    C1, C_in, k1, _ = w1.shape
    C2, _, k2, _ = w2.shape
    kk = k2 * k2
    K1 = C_in * k1 * k1

    # conv1 weight as (K1, C1), rows ordered (c_in, a, b), expanded to a
    # block-diagonal (kk*K1, kk*C1): one matmul maps a full stage-2 patch row
    # to all kk stage-1 outputs, already (dh, dw, c1)-contiguous.
    w1r = jnp.asarray(w1, jnp.float32).reshape(C1, K1).T
    w1blk = jnp.kron(jnp.eye(kk, dtype=jnp.float32), w1r)           # (kk*K1, kk*C1)

    # conv2 weight with rows ordered (dh, dw, c1) -- matches the activation
    # column order produced by the block-diagonal conv1.
    w2r = jnp.transpose(jnp.asarray(w2, jnp.float32), (2, 3, 1, 0)).reshape(kk * C1, C2)

    # GroupNorm affine params tiled kk times to match the (dh, dw, c1) columns.
    g_t = jnp.tile(jnp.asarray(g1, jnp.float32), kk).reshape(1, 1, kk * C1)
    b_t = jnp.tile(jnp.asarray(beta1, jnp.float32), kk).reshape(1, 1, kk * C1)

    b2r = jnp.asarray(b2, jnp.float32).reshape(1, C2)

    arrays = (w1blk.astype(mxu_dtype), g_t, b_t, w2r.astype(mxu_dtype), b2r)
    return arrays, (int(k1), int(k2))


# ---------------- grid / VMEM sizing ------------------------------------------

def _choose_grid_b(B, in_elems_per_sample, out_elems_per_sample, in_itemsize):
    """Split the batch across TensorCores only when per-core work dwarfs the
    ~0.35us per-grid-step overhead (v7x megacore); grow the split further only
    if needed to keep the double-buffered per-step working set under a VMEM
    budget that is safe on every generation (v7x: 64 MiB per core)."""
    def step_bytes(tb):
        return 2 * tb * (in_elems_per_sample * in_itemsize + out_elems_per_sample * 4)

    grid_b = 1
    if B % 2 == 0 and (B // 2) * in_elems_per_sample >= (1 << 17):
        grid_b = 2                       # worthwhile only on v7x / large batches
    budget = 24 << 20
    while grid_b < B and step_bytes(B // grid_b) > budget:
        grid_b += 1
        while B % grid_b != 0 and grid_b < B:
            grid_b += 1
    return grid_b


# ---------------- forward ------------------------------------------------------

@partial(jax.jit, static_argnames=("k1", "k2"))
def patch_embed_conv(x, w1blk, gamma_t, beta_t, w2r, b2r, *, k1, k2):
    B, C_in, H, W = x.shape
    KP, CE = w1blk.shape
    C2 = w2r.shape[1]
    H2, W2 = H // (k1 * k2), W // (k1 * k2)
    N2 = H2 * W2

    # Stage-2 patch extraction: one row per final patch, holding its kk
    # stage-1 sub-patches back to back ((dh, dw) order, each (c, a, b) order).
    #   h = (h2*k2 + dh)*k1 + a ,  w = (w2*k2 + dw)*k1 + b
    xp = x.reshape(B, C_in, H2, k2, k1, W2, k2, k1)
    xp = jnp.transpose(xp, (0, 2, 5, 3, 6, 1, 4, 7))   # (B, h2, w2, dh, dw, c, a, b)
    p = xp.reshape(B, N2, KP).astype(w1blk.dtype)

    grid_b = _choose_grid_b(B, N2 * KP, N2 * C2, jnp.dtype(p.dtype).itemsize)
    TB = B // grid_b

    # vmem_limit derived from the actual working set (double-buffered blocks +
    # weights), clamped to a range safe on v5e/v6e (128 MiB) and v7x (64 MiB).
    w_bytes = sum(int(a.size) * jnp.dtype(a.dtype).itemsize
                  for a in (w1blk, gamma_t, beta_t, w2r, b2r))
    step_bytes = 2 * TB * (N2 * KP * jnp.dtype(p.dtype).itemsize + N2 * C2 * 4)
    vmem_limit = int(min(48 << 20, max(16 << 20, 2 * (step_bytes + w_bytes))))

    out = pl.pallas_call(
        _fused_kernel,
        out_shape=jax.ShapeDtypeStruct((B, N2, C2), jnp.float32),
        grid=(grid_b,),
        in_specs=[
            pl.BlockSpec((TB, N2, KP), lambda b: (b, 0, 0)),
            pl.BlockSpec((KP, CE), lambda b: (0, 0)),
            pl.BlockSpec((1, 1, CE), lambda b: (0, 0, 0)),
            pl.BlockSpec((1, 1, CE), lambda b: (0, 0, 0)),
            pl.BlockSpec((CE, C2), lambda b: (0, 0)),
            pl.BlockSpec((1, C2), lambda b: (0, 0)),
        ],
        out_specs=pl.BlockSpec((TB, N2, C2), lambda b: (b, 0, 0)),
        compiler_params=pltpu.CompilerParams(
            dimension_semantics=("parallel",),
            # Let XLA fuse the reshape+transpose producing `p` into the pallas
            # input DMA instead of materializing the patch tensor in HBM.
            allow_input_fusion=[True, False, False, False, False, False],
            vmem_limit_bytes=vmem_limit,
        ),
    )(p, w1blk, gamma_t, beta_t, w2r, b2r)

    # out is already (B, num_patches, embed_dim) == proj(x).flatten(2).transpose(1, 2)
    return out


# ---------------- pure-JAX reference (for correctness check) -----------------

def reference(x, params):
    (w1, g1, beta1), (w2, b2) = params
    dn = ("NCHW", "OIHW", "NCHW")
    k1 = w1.shape[2]
    k2 = w2.shape[2]
    y = lax.conv_general_dilated(x, w1, (k1, k1), "VALID", dimension_numbers=dn)
    mean = jnp.mean(y, axis=(1, 2, 3), keepdims=True)
    var = jnp.var(y, axis=(1, 2, 3), keepdims=True)
    y = (y - mean) / jnp.sqrt(var + GN_EPS)
    y = y * g1.reshape(1, -1, 1, 1) + beta1.reshape(1, -1, 1, 1)
    y = 0.5 * y * (1.0 + lax.erf(y / jnp.sqrt(2.0)))
    y = lax.conv_general_dilated(y, w2, (k2, k2), "VALID", dimension_numbers=dn)
    y = y + b2.reshape(1, -1, 1, 1)
    B, C2, H2, W2 = y.shape
    return jnp.transpose(y.reshape(B, C2, H2 * W2), (0, 2, 1))


# ---------------- main --------------------------------------------------------

if __name__ == "__main__":
    key = jax.random.PRNGKey(0)
    kx, kw1, kg1, kb1, kw2, kb2 = jax.random.split(key, 6)

    B, C_in, H, W = 2, 4, 16, 16
    C1, k1 = 16, 2
    C2, k2 = 32, 2

    x = jax.random.normal(kx, (B, C_in, H, W), dtype=jnp.float32)

    # deterministic synthetic parameters (module shapes)
    w1 = jax.random.normal(kw1, (C1, C_in, k1, k1), dtype=jnp.float32) * 0.1
    g1 = 1.0 + 0.05 * jax.random.normal(kg1, (C1,), dtype=jnp.float32)
    beta1 = 0.05 * jax.random.normal(kb1, (C1,), dtype=jnp.float32)
    w2 = jax.random.normal(kw2, (C2, C1, k2, k2), dtype=jnp.float32) * 0.1
    b2 = 0.05 * jax.random.normal(kb2, (C2,), dtype=jnp.float32)

    params = ((w1, g1, beta1), (w2, b2))
    ref = reference(x, params)

    # f32 MXU path (matches the module to ~1e-4)
    arrays, (sk1, sk2) = prepare_params(params)
    out = jax.block_until_ready(patch_embed_conv(x, *arrays, k1=sk1, k2=sk2))
    assert out.shape == (B, 16, C2), out.shape   # (B, num_patches, embed_dim)
    assert jnp.allclose(out, ref, atol=1e-4, rtol=1e-4), float(
        jnp.max(jnp.abs(out - ref)))

    # bf16 MXU path (production-size option): matmul inputs bf16, GN/GELU f32.
    arrays_bf16, _ = prepare_params(params, mxu_dtype=jnp.bfloat16)
    out_bf16 = jax.block_until_ready(
        patch_embed_conv(x, *arrays_bf16, k1=sk1, k2=sk2))
    assert out_bf16.shape == out.shape
    assert bool(jnp.all(jnp.isfinite(out_bf16)))
    assert float(jnp.max(jnp.abs(out_bf16 - ref))) < 1e-1   # loose bf16 tolerance

    print("KERNEL_OK")
</pallas_src>

<mosaic_0001>
module attributes {stable_mosaic.version = 11 : i64} {
  func.func @_fused_kernel(%arg0: i32, %arg1: memref<2x16x64xf32, #tpu.memory_space<vmem>>, %arg2: memref<64x64xf32, #tpu.memory_space<vmem>>, %arg3: memref<1x1x64xf32, #tpu.memory_space<vmem>>, %arg4: memref<1x1x64xf32, #tpu.memory_space<vmem>>, %arg5: memref<64x32xf32, #tpu.memory_space<vmem>>, %arg6: memref<1x32xf32, #tpu.memory_space<vmem>>, %arg7: memref<2x16x32xf32, #tpu.memory_space<vmem>>) attributes {dimension_semantics = [#tpu.dimension_semantics<parallel>], iteration_bounds = array<i64: 1>, scalar_prefetch = 0 : i64, scratch_operands = 0 : i64, tpu.core_type = #tpu.core_type<tc>, window_params = [{transform_indices = @transform_0, window_bounds = array<i64: 2, 16, 64>}, {pipeline_mode = #tpu.pipeline_mode<synchronous>, transform_indices = @transform_1, window_bounds = array<i64: 64, 64>}, {pipeline_mode = #tpu.pipeline_mode<synchronous>, transform_indices = @transform_2, window_bounds = array<i64: 1, 1, 64>}, {pipeline_mode = #tpu.pipeline_mode<synchronous>, transform_indices = @transform_3, window_bounds = array<i64: 1, 1, 64>}, {pipeline_mode = #tpu.pipeline_mode<synchronous>, transform_indices = @transform_4, window_bounds = array<i64: 64, 32>}, {pipeline_mode = #tpu.pipeline_mode<synchronous>, transform_indices = @transform_5, window_bounds = array<i64: 1, 32>}, {transform_indices = @transform_6, window_bounds = array<i64: 2, 16, 32>}]} {
    %c0 = arith.constant 0 : index
    %c0_0 = arith.constant 0 : index
    %c0_1 = arith.constant 0 : index
    %0 = vector.load %arg1[%c0, %c0_0, %c0_1] : memref<2x16x64xf32, #tpu.memory_space<vmem>>, vector<2x16x64xf32>
    %1 = vector.shape_cast %0 : vector<2x16x64xf32> to vector<32x64xf32>
    %c0_2 = arith.constant 0 : index
    %c0_3 = arith.constant 0 : index
    %2 = vector.load %arg2[%c0_2, %c0_3] : memref<64x64xf32, #tpu.memory_space<vmem>>, vector<64x64xf32>
    %cst = arith.constant dense<0.000000e+00> : vector<32x64xf32>
    %3 = tpu.matmul %1, %2, %cst {dimension_numbers = #tpu.dot_dimension_numbers<[1], [0], [0], [1], [0, 0, 1, 1], [], []>} : vector<32x64xf32>, vector<64x64xf32>, vector<32x64xf32> -> vector<32x64xf32>
    %4 = vector.shape_cast %3 : vector<32x64xf32> to vector<2x16x64xf32>
    %cst_4 = arith.constant dense<0.000000e+00> : vector<2x16xf32>
    %5 = vector.multi_reduction <add>, %4, %cst_4 [2] : vector<2x16x64xf32> to vector<2x16xf32>
    %6 = vector.shape_cast %5 : vector<2x16xf32> to vector<2x16x1xf32>
    %cst_5 = arith.constant dense<0.000000e+00> : vector<2x1xf32>
    %7 = vector.multi_reduction <add>, %6, %cst_5 [1] : vector<2x16x1xf32> to vector<2x1xf32>
    %8 = vector.shape_cast %7 : vector<2x1xf32> to vector<2x1x1xf32>
    %cst_6 = arith.constant 9.765625E-4 : f32
    %9 = vector.broadcast %cst_6 : f32 to vector<2x1x1xf32>
    %10 = arith.mulf %8, %9 : vector<2x1x1xf32>
    %11 = vector.broadcast %10 : vector<2x1x1xf32> to vector<2x16x64xf32>
    %12 = arith.subf %4, %11 : vector<2x16x64xf32>
    %13 = arith.mulf %12, %12 : vector<2x16x64xf32>
    %cst_7 = arith.constant dense<0.000000e+00> : vector<2x16xf32>
    %14 = vector.multi_reduction <add>, %13, %cst_7 [2] : vector<2x16x64xf32> to vector<2x16xf32>
    %15 = vector.shape_cast %14 : vector<2x16xf32> to vector<2x16x1xf32>
    %cst_8 = arith.constant dense<0.000000e+00> : vector<2x1xf32>
    %16 = vector.multi_reduction <add>, %15, %cst_8 [1] : vector<2x16x1xf32> to vector<2x1xf32>
    %17 = vector.shape_cast %16 : vector<2x1xf32> to vector<2x1x1xf32>
    %cst_9 = arith.constant 9.765625E-4 : f32
    %18 = vector.broadcast %cst_9 : f32 to vector<2x1x1xf32>
    %19 = arith.mulf %17, %18 : vector<2x1x1xf32>
    %c0_10 = arith.constant 0 : index
    %c0_11 = arith.constant 0 : index
    %c0_12 = arith.constant 0 : index
    %20 = vector.load %arg3[%c0_10, %c0_11, %c0_12] : memref<1x1x64xf32, #tpu.memory_space<vmem>>, vector<1x1x64xf32>
    %cst_13 = arith.constant 9.99999974E-6 : f32
    %21 = vector.broadcast %cst_13 : f32 to vector<2x1x1xf32>
    %22 = arith.addf %19, %21 : vector<2x1x1xf32>
    %23 = math.rsqrt %22 : vector<2x1x1xf32>
    %24 = vector.broadcast %20 : vector<1x1x64xf32> to vector<2x1x64xf32>
    %25 = vector.broadcast %23 : vector<2x1x1xf32> to vector<2x1x64xf32>
    %26 = arith.mulf %24, %25 : vector<2x1x64xf32>
    %27 = vector.broadcast %26 : vector<2x1x64xf32> to vector<2x16x64xf32>
    %28 = arith.mulf %12, %27 : vector<2x16x64xf32>
    %c0_14 = arith.constant 0 : index
    %c0_15 = arith.constant 0 : index
    %c0_16 = arith.constant 0 : index
    %29 = vector.load %arg4[%c0_14, %c0_15, %c0_16] : memref<1x1x64xf32, #tpu.memory_space<vmem>>, vector<1x1x64xf32>
    %30 = vector.broadcast %29 : vector<1x1x64xf32> to vector<2x16x64xf32>
    %31 = arith.addf %28, %30 : vector<2x16x64xf32>
    %cst_17 = arith.constant 5.000000e-01 : f32
    %32 = vector.broadcast %cst_17 : f32 to vector<2x16x64xf32>
    %33 = arith.mulf %32, %31 : vector<2x16x64xf32>
    %cst_18 = arith.constant 0.707106769 : f32
    %34 = vector.broadcast %cst_18 : f32 to vector<2x16x64xf32>
    %35 = arith.mulf %31, %34 : vector<2x16x64xf32>
    %36 = math.erf %35 : vector<2x16x64xf32>
    %cst_19 = arith.constant 1.000000e+00 : f32
    %37 = vector.broadcast %cst_19 : f32 to vector<2x16x64xf32>
    %38 = arith.addf %37, %36 : vector<2x16x64xf32>
    %39 = arith.mulf %33, %38 : vector<2x16x64xf32>
    %40 = vector.shape_cast %39 : vector<2x16x64xf32> to vector<32x64xf32>
    %c0_20 = arith.constant 0 : index
    %c0_21 = arith.constant 0 : index
    %41 = vector.load %arg5[%c0_20, %c0_21] : memref<64x32xf32, #tpu.memory_space<vmem>>, vector<64x32xf32>
    %cst_22 = arith.constant dense<0.000000e+00> : vector<32x32xf32>
    %42 = tpu.matmul %40, %41, %cst_22 {dimension_numbers = #tpu.dot_dimension_numbers<[1], [0], [0], [1], [0, 0, 1, 1], [], []>} : vector<32x64xf32>, vector<64x32xf32>, vector<32x32xf32> -> vector<32x32xf32>
    %c0_23 = arith.constant 0 : index
    %c0_24 = arith.constant 0 : index
    %43 = vector.load %arg6[%c0_23, %c0_24] : memref<1x32xf32, #tpu.memory_space<vmem>>, vector<1x32xf32>
    %44 = vector.broadcast %43 : vector<1x32xf32> to vector<32x32xf32>
    %45 = arith.addf %42, %44 : vector<32x32xf32>
    %46 = vector.shape_cast %45 : vector<32x32xf32> to vector<2x16x32xf32>
    %c0_25 = arith.constant 0 : index
    %c0_26 = arith.constant 0 : index
    %c0_27 = arith.constant 0 : index
    %47 = vector.load %arg7[%c0_25, %c0_26, %c0_27] : memref<2x16x32xf32, #tpu.memory_space<vmem>>, vector<2x16x32xf32>
    tpu.vector_store %arg7[%c0_25, %c0_26, %c0_27], %46 {strides = array<i32>} : memref<2x16x32xf32, #tpu.memory_space<vmem>>, vector<2x16x32xf32>,
    return
  }
  func.func @transform_0(%arg0: i32) -> (i32, i32, i32) {
    %c0_i32 = arith.constant 0 : i32
    %c0_i32_0 = arith.constant 0 : i32
    %c0_i32_1 = arith.constant 0 : i32
    return %arg0, %c0_i32, %c0_i32_0 : i32, i32, i32
  }
  func.func @transform_1(%arg0: i32) -> (i32, i32) {
    %c0_i32 = arith.constant 0 : i32
    %c0_i32_0 = arith.constant 0 : i32
    %c0_i32_1 = arith.constant 0 : i32
    return %c0_i32, %c0_i32_0 : i32, i32
  }
  func.func @transform_2(%arg0: i32) -> (i32, i32, i32) {
    %c0_i32 = arith.constant 0 : i32
    %c0_i32_0 = arith.constant 0 : i32
    %c0_i32_1 = arith.constant 0 : i32
    %c0_i32_2 = arith.constant 0 : i32
    return %c0_i32, %c0_i32_0, %c0_i32_1 : i32, i32, i32
  }
  func.func @transform_3(%arg0: i32) -> (i32, i32, i32) {
    %c0_i32 = arith.constant 0 : i32
    %c0_i32_0 = arith.constant 0 : i32
    %c0_i32_1 = arith.constant 0 : i32
    %c0_i32_2 = arith.constant 0 : i32
    return %c0_i32, %c0_i32_0, %c0_i32_1 : i32, i32, i32
  }
  func.func @transform_4(%arg0: i32) -> (i32, i32) {
    %c0_i32 = arith.constant 0 : i32
    %c0_i32_0 = arith.constant 0 : i32
    %c0_i32_1 = arith.constant 0 : i32
    return %c0_i32, %c0_i32_0 : i32, i32
  }
  func.func @transform_5(%arg0: i32) -> (i32, i32) {
    %c0_i32 = arith.constant 0 : i32
    %c0_i32_0 = arith.constant 0 : i32
    %c0_i32_1 = arith.constant 0 : i32
    return %c0_i32, %c0_i32_0 : i32, i32
  }
  func.func @transform_6(%arg0: i32) -> (i32, i32, i32) {
    %c0_i32 = arith.constant 0 : i32
    %c0_i32_0 = arith.constant 0 : i32
    %c0_i32_1 = arith.constant 0 : i32
    return %arg0, %c0_i32, %c0_i32_0 : i32, i32, i32
  }
}

</mosaic_0001>

<bundles_post_ra>
// kernel: patch_embed_conv.1
= control target key start
LH: loop header
LB: loop body
LE: loop exit
PB: predicated region body
PF: predicated region fallthrough
CT: control target
= control target key end

     0   :  { %vm36_vm0 = vcmask 523264   ;;  %s646_s0 = inlined_call_operand.vmem [shape: f32[2,16,64], index: 0, kind: input, shape index: {}]   ;;  %s647_s1 = inlined_call_operand.vmem [shape: f32[64,64], index: 1, kind: input, shape index: {}]   ;;  %s648_s2 = inlined_call_operand.vmem [shape: f32[1,1,64], index: 2, kind: input, shape index: {}]   ;;  %s649_s3 = inlined_call_operand.vmem [shape: f32[1,1,64], index: 3, kind: input, shape index: {}]   ;;  %s650_s4 = inlined_call_operand.vmem [shape: f32[64,32], index: 4, kind: input, shape index: {}]   ;;  %s651_s5 = inlined_call_operand.vmem [shape: f32[1,32], index: 5, kind: input, shape index: {}]   ;;  %s652_s6 = inlined_call_operand.hbm [shape: f32[2,16,32], index: 6, kind: output, shape index: {}]  }
   0x1   :  { %v35_v0 = vld [vmem:[%s647_s1 + $0x38] sm:$0xff]  ;;  %v34_v1 = vld [vmem:[%s647_s1 + $0x30] sm:$0xff]  ;;  %v33_v2 = vld [vmem:[%s647_s1 + $0x28] sm:$0xff] }
   0x2   :  { %419 = vmatprep.subr.mxu0 %v35_v0  ;;  %v24_v3 = vld [vmem:[%s646_s0] sm:$0xff] }
   0x3   :  { %420 = vmatpush3.msra.mxu0 %v35_v0  ;;  %435 = vmatprep.mubr.msk.f32.mxu0 %vm36_vm0, %v24_v3  ;;  %v32_v4 = vld [vmem:[%s647_s1 + $0x20] sm:$0xff] }
   0x4   :  { %421 = vmatprep.subr.mxu0 %v34_v1 }
   0x5   :  { %422 = vmatpush3.msra.mxu0 %v34_v1 }
   0x6   :  { %11 = vsyncpa [#allocation3], 0  ;;  %423 = vmatprep.subr.mxu0 %v33_v2  ;;  %v31_v5 = vld [vmem:[%s647_s1 + $0x18] sm:$0xff]  ;;  %v30_v6 = vld [vmem:[%s647_s1 + $0x10] sm:$0xff]  ;;  %vm364_vm1 = vcmask 261120   ;;  %s500_s14 = smov [#allocation2]  }
   0x7   :  { %424 = vmatpush3.msra.mxu0 %v33_v2  ;;  %v29_v7 = vld [vmem:[%s647_s1 + $0x8] sm:$0xff]  ;;  %v28_v8 = vld [vmem:[%s647_s1] sm:$0xff]  ;;  %v26_v10 = vld [vmem:[%s646_s0 + $0x10] sm:$0xff]  ;;  %s374_s15 = sshll.u32 %s500_s14, 4  ;;  %s375_s15 = int_to_ptr.vmem [resolvable:$true] %s374_s15 }
   0x8   :  { %425 = vmatprep.subr.mxu0 %v32_v4  ;;  %v25_v9 = vld [vmem:[%s646_s0 + $0x8] sm:$0xff]  ;;  %v27_v11 = vld [vmem:[%s646_s0 + $0x18] sm:$0xff]  ;;  %v258_v53 = vld [vmem:[%s650_s4 + $0x30] sm:$0xff]  ;;  %s478_s16 = scalar_lea.vmem %s375_s15, 512  ;;  %p483_p1 = scmp.lt.s32.totalorder %s375_s15, %s375_s15 }
   0x9   :  { %426 = vmatpush3.msra.mxu0 %v32_v4  ;;  %v259_v52 = vld [vmem:[%s650_s4 + $0x38] sm:$0xff]  ;;  %v257_v54 = vld [vmem:[%s650_s4 + $0x28] sm:$0xff]  ;;  %v256_v55 = vld [vmem:[%s650_s4 + $0x20] sm:$0xff]  ;;  %p479_p0 = scmp.ne.s32.totalorder %s375_s15, %s478_s16  ;;  %p484_p2 = scmp.lt.s32.totalorder %s478_s16, %s478_s16 }
   0xa   :  { %427 = vmatprep.subr.mxu0 %v31_v5  ;;  %441 = vmatprep.subr.mxu1 %v259_v52  ;;  %v255_v56 = vld [vmem:[%s650_s4 + $0x18] sm:$0xff]  ;;  %v254_v57 = vld [vmem:[%s650_s4 + $0x10] sm:$0xff]  ;;  %v253_v58 = vld [vmem:[%s650_s4 + $0x8] sm:$0xff] }
   0xb   :  { %428 = vmatpush3.msra.mxu0 %v31_v5  ;;  %442 = vmatpush3.msra.mxu1 %v259_v52  ;;  %v252_v59 = vld [vmem:[%s650_s4] sm:$0xff]  ;;  %p485_p3 = por %p484_p2, %p483_p1 }
   0xc   :  { %429 = vmatprep.subr.mxu0 %v30_v6  ;;  %443 = vmatprep.subr.mxu1 %v258_v53 }
   0xd   :  { %430 = vmatpush3.msra.mxu0 %v30_v6  ;;  %444 = vmatpush3.msra.mxu1 %v258_v53  ;;  %p486_p4 = pnand %p485_p3, %p479_p0 }
   0xe   :  { %431 = vmatprep.subr.mxu0 %v29_v7  ;;  %445 = vmatprep.subr.mxu1 %v257_v54 }
   0xf   :  { %432 = vmatpush3.msra.mxu0 %v29_v7  ;;  %446 = vmatpush3.msra.mxu1 %v257_v54 }
  0x10   :  { %433 = vmatprep.subr.mxu0 %v28_v8  ;;  %447 = vmatprep.subr.mxu1 %v256_v55 }
  0x11   :  { %434 = vmatpush3.msra.mxu0 %v28_v8  ;;  %448 = vmatpush3.msra.mxu1 %v256_v55 }
  0x12   :  { %436 = vmatmul.mubr.msk.f32.vlgmr.msra.gmra.mxu0 %vm36_vm0, %v25_v9  ;;  %449 = vmatprep.subr.mxu1 %v255_v56 }
  0x13   :  { %438 = vmatprep.mubr.msk.f32.mxu0 %vm36_vm0, %v26_v10  ;;  %450 = vmatpush3.msra.mxu1 %v255_v56 }
  0x14   :  { %451 = vmatprep.subr.mxu1 %v254_v57 }
  0x15   :  { %452 = vmatpush3.msra.mxu1 %v254_v57  ;;  %v390_v57 = vld [vmem:[%s651_s5] ss:$0 sm:$0xff] }
  0x16   :  { %439 = vmatmul.mubr.msk.f32.gmra.mxu0 %vm36_vm0, %v27_v11  ;;  %453 = vmatprep.subr.mxu1 %v253_v58 }
  0x17   :  { %454 = vmatpush3.msra.mxu1 %v253_v58 }
  0x18   :  { %455 = vmatprep.subr.mxu1 %v252_v59 }
  0x19   :  { %456 = vmatpush3.msra.mxu1 %v252_v59 }
  0xd2   :  { %v437_v12 = vpop.f32.mrf.mxu0 }
  0xd3   :  { %v137_v17 = vsel %vm36_vm0, %v437_v12, 0.0 }
  0xd4   :  { %v115_v13 = vpop.f32.mrf.mxu0 }
  0xd5   :  { %v134_v14 = vsel %vm36_vm0, %v115_v13, 0.0 }
  0xd6   :  { %135 = vadd.xlane.f32.xlu0 %v134_v14  ;;  %v440_v15 = vpop.f32.mrf.mxu0 }
  0xd7   :  { %v143_v19 = vsel %vm36_vm0, %v440_v15, 0.0 }
  0xd8   :  { %v125_v16 = vpop.f32.mrf.mxu0 }
  0xd9   :  { %v140_v18 = vsel %vm36_vm0, %v125_v16, 0.0 }
  0xda   :  { %138 = vadd.xlane.f32.xlu0 %v137_v17  ;;  %141 = vadd.xlane.f32.xlu1 %v140_v18  ;;  %v207_v18 = vlaneseq }
  0xde   :  { %144 = vadd.xlane.f32.xlu1 %v143_v19  ;;  %v208_v19 = vshrl.u32 %v207_v18, 7 }
 0x15f   :  { %v136_v20 = vpop.xlane.xlu0 %135 }
 0x163   :  { %v139_v21 = vpop.xlane.xlu0 %138  ;;  %v142_v22 = vpop.xlane.xlu1 %141 }
 0x164   :  { %v146_v23 = vadd.f32 %v139_v21, %v136_v20  ;;  %v198_v20 = vld [vmem:[%s648_s2] sm:$0x1]  ;;  %v209_v21 = vsub.s32 0, %v208_v19 }
 0x166   :  { %v147_v24 = vrot.slane %v146_v23, 4 }
 0x167   :  { %v145_v25 = vpop.xlane.xlu1 %144 }
 0x168   :  { %v148_v26 = vadd.f32 %v147_v24, %v146_v23  ;;  %v153_v27 = vadd.f32 %v145_v25, %v142_v22 }
 0x16a   :  { %v149_v28 = vrot.slane %v148_v26, 2  ;;  %v154_v29 = vrot.slane %v153_v27, 4 }
 0x16c   :  { %v150_v30 = vadd.f32 %v149_v28, %v148_v26  ;;  %v155_v31 = vadd.f32 %v154_v29, %v153_v27  ;;  %v389_v26 = vld [vmem:[%s649_s3] ss:$0 sm:$0xff] }
 0x16e   :  { %v151_v32 = vrot.slane %v150_v30, 1  ;;  %v156_v33 = vrot.slane %v155_v31, 2 }
 0x170   :  { %v152_v34 = vadd.f32 %v151_v32, %v150_v30  ;;  %v157_v35 = vadd.f32 %v156_v33, %v155_v31 }
 0x172   :  { %v158_v36 = vrot.slane %v157_v35, 1  ;;  %v160_v37 = vmul.f32 0.0009765625, %v152_v34 }
 0x174   :  { %v159_v38 = vadd.f32 %v158_v36, %v157_v35  ;;  %v582_v39 = vsub.f32 %v115_v13, %v160_v37  ;;  %v584_v40 = vsub.f32 %v437_v12, %v160_v37 }
 0x176   :  { %v166_v41 = vmul.f32 %v582_v39, %v582_v39  ;;  %v167_v42 = vmul.f32 %v584_v40, %v584_v40  ;;  %v161_v43 = vmul.f32 0.0009765625, %v159_v38 }
 0x178   :  { %v170_v44 = vsel %vm36_vm0, %v166_v41, 0.0  ;;  %v173_v45 = vsel %vm36_vm0, %v167_v42, 0.0  ;;  %v592_v46 = vsub.f32 %v440_v15, %v161_v43  ;;  %v594_v47 = vsub.f32 %v125_v16, %v161_v43 }
 0x179   :  { %171 = vadd.xlane.f32.xlu0 %v170_v44  ;;  %174 = vadd.xlane.f32.xlu1 %v173_v45 }
 0x17a   :  { %v169_v48 = vmul.f32 %v592_v46, %v592_v46  ;;  %v168_v49 = vmul.f32 %v594_v47, %v594_v47 }
 0x17c   :  { %v179_v50 = vsel %vm36_vm0, %v169_v48, 0.0  ;;  %v176_v51 = vsel %vm36_vm0, %v168_v49, 0.0 }
 0x17d   :  { %180 = vadd.xlane.f32.xlu1 %v179_v50  ;;  %177 = vadd.xlane.f32.xlu0 %v176_v51 }
 0x202   :  { %v172_v60 = vpop.xlane.xlu0 %171  ;;  %v175_v61 = vpop.xlane.xlu1 %174 }
 0x203   :  { %v182_v62 = vadd.f32 %v175_v61, %v172_v60 }
 0x205   :  { %v183_v63 = vrot.slane %v182_v62, 4 }
 0x206   :  { %v178_v0 = vpop.xlane.xlu0 %177  ;;  %v181_v1 = vpop.xlane.xlu1 %180 }
 0x207   :  { %v184_v2 = vadd.f32 %v183_v63, %v182_v62  ;;  %v189_v3 = vadd.f32 %v181_v1, %v178_v0 }
 0x209   :  { %v185_v4 = vrot.slane %v184_v2, 2  ;;  %v190_v5 = vrot.slane %v189_v3, 4 }
 0x20b   :  { %v186_v6 = vadd.f32 %v185_v4, %v184_v2  ;;  %v191_v7 = vadd.f32 %v190_v5, %v189_v3 }
 0x20d   :  { %v187_v8 = vrot.slane %v186_v6, 1  ;;  %v192_v9 = vrot.slane %v191_v7, 2 }
 0x20f   :  { %v188_v10 = vadd.f32 %v187_v8, %v186_v6  ;;  %v193_v11 = vadd.f32 %v192_v9, %v191_v7 }
 0x211   :  { %v196_v12 = vmul.f32 0.0009765625, %v188_v10  ;;  %v194_v13 = vrot.slane %v193_v11, 1 }
 0x213   :  { %v199_v14 = vadd.f32 1e-05, %v196_v12  ;;  %v195_v15 = vadd.f32 %v194_v13, %v193_v11 }
 0x215   :  { %466 = vrsqrt.f32 %v199_v14  ;;  %v197_v16 = vmul.f32 0.0009765625, %v195_v15 }
 0x217   :  { %v200_v17 = vadd.f32 1e-05, %v197_v16 }
 0x219   :  { %468 = vrsqrt.f32 %v200_v17 }
 0x222   :  { %v467_v22 = vpop.eup %466 }
 0x223   :  { %v203_v23 = vmul.f32 %v467_v22, %v198_v20 }
 0x225   :  { %v210_v24 = vrot.slane %v203_v23, %v209_v21 }
 0x226   :  { %v469_v25 = vpop.eup %468 }
 0x227   :  { %v204_v27 = vmul.f32 %v469_v25, %v198_v20  ;;  %v217_v28 = vmul.f32 %v210_v24, %v582_v39  ;;  %v218_v29 = vmul.f32 %v210_v24, %v584_v40 }
 0x229   :  { %v214_v30 = vrot.slane %v204_v27, %v209_v21  ;;  %v228_v31 = vadd.f32 %v389_v26, %v217_v28  ;;  %v229_v32 = vadd.f32 %v389_v26, %v218_v29 }
 0x22b   :  { %v236_v33 = vmul.f32 0.70710677, %v228_v31  ;;  %v237_v34 = vmul.f32 0.70710677, %v229_v32  ;;  %v219_v35 = vmul.f32 %v214_v30, %v594_v47  ;;  %v220_v36 = vmul.f32 %v214_v30, %v592_v46 }
 0x22c   :  { %v232_v40 = vmul.f32 0.5, %v228_v31  ;;  %v233_v45 = vmul.f32 0.5, %v229_v32 }
 0x22d   :  { %470 = verf.f32 %v236_v33  ;;  %v230_v37 = vadd.f32 %v389_v26, %v219_v35  ;;  %v231_v38 = vadd.f32 %v389_v26, %v220_v36 }
 0x22e   :  { %472 = verf.f32 %v237_v34 }
 0x22f   :  { %v238_v41 = vmul.f32 0.70710677, %v230_v37  ;;  %v239_v42 = vmul.f32 0.70710677, %v231_v38  ;;  %v234_v47 = vmul.f32 0.5, %v230_v37  ;;  %v235_v53 = vmul.f32 0.5, %v231_v38 }
 0x231   :  { %474 = verf.f32 %v238_v41 }
 0x232   :  { %476 = verf.f32 %v239_v42 }
 0x23a   :  { %v471_v39 = vpop.eup %470 }
 0x23b   :  { %v473_v43 = vpop.eup %472  ;;  %v244_v44 = vadd.f32 1.0, %v471_v39 }
 0x23c   :  { %v245_v48 = vadd.f32 1.0, %v473_v43 }
 0x23d   :  { %v248_v49 = vmul.f32 %v244_v44, %v232_v40 }
 0x23e   :  { %v249_v50 = vmul.f32 %v245_v48, %v233_v45  ;;  %v475_v51 = vpop.eup %474 }
 0x23f   :  { %457 = vmatprep.mubr.msk.f32.mxu1 %vm36_vm0, %v248_v49  ;;  %v477_v46 = vpop.eup %476  ;;  %v246_v52 = vadd.f32 1.0, %v475_v51 }
 0x240   :  { %458 = vmatmul.mubr.msk.f32.vlgmr.msra.gmra.mxu1 %vm36_vm0, %v249_v50  ;;  %v247_v54 = vadd.f32 1.0, %v477_v46 }
 0x241   :  { %v250_v55 = vmul.f32 %v246_v52, %v234_v47 }
 0x242   :  { %v251_v56 = vmul.f32 %v247_v54, %v235_v53 }
 0x243   :  { %460 = vmatprep.mubr.msk.f32.mxu1 %vm36_vm0, %v250_v55 }
 0x244   :  { %461 = vmatmul.mubr.msk.f32.gmra.mxu1 %vm36_vm0, %v251_v56 }
 0x300   :  { %v459_v58 = vpop.f32.mrf.mxu1 }
 0x301   :  { %v351_v59 = vadd.f32 %v459_v58, %v390_v57 }
 0x302   :  { %v345_v60 = vpop.f32.mrf.mxu1 }
 0x303   :  { %366 = vst.msk [vmem:[#allocation2 + $0x8] sm:$0xff] %vm364_vm1, %v351_v59  ;;  %v346_v61 = vadd.f32 %v390_v57, %v345_v60 }
 0x304   :  { %v462_v62 = vpop.f32.mrf.mxu1 }
 0x305   :  { %365 = vst.msk [vmem:[#allocation2] sm:$0xff] %vm364_vm1, %v346_v61  ;;  %v361_v63 = vadd.f32 %v462_v62, %v390_v57 }
 0x306   :  { %v355_v0 = vpop.f32.mrf.mxu1 }
 0x307   :  { %368 = vst.msk [vmem:[#allocation2 + $0x18] sm:$0xff] %vm364_vm1, %v361_v63  ;;  %v356_v1 = vadd.f32 %v390_v57, %v355_v0 }
 0x309   :  { %367 = vst.msk [vmem:[#allocation2 + $0x10] sm:$0xff] %vm364_vm1, %v356_v1 }
 0x30a   :  { %489 = shalt.err (!%p486_p4)
}
 0x30b   :  { %s501_s5 = smov 128   ;;  %s502_s17 = smov 8  }
 0x30c   :  { %380 = dma.vmem_to_hbm [thread:$0]  %s375_s15, 512, %s652_s6, [#allocation3], %s501_s5, %s501_s5, %s502_s17  }
 0x30d   :  { %498 = dma.done.wait [#allocation3], 512  }
 0x30e   :  { %499 = vsyncadd [#allocation3], 4294966784 }
 0x30f   :  { %384 = vsyncpa [#allocation3], 1 }

</bundles_post_ra>
